<compile_context>
chip_gen: v5e
topology: v5e:2x2
jax: 0.10.0
libtpu: 0.0.40
codegen_flags: <defaults>
</compile_context>

<pallas_src>
import math
import numpy as np
import jax
import jax.numpy as jnp
from jax.experimental import pallas as pl
from jax.experimental.pallas import tpu as pltpu

VMEM = pltpu.MemorySpace.VMEM


def _compiler_params(**kw):
    # Defensive shim against jax version skew; current API is pltpu.CompilerParams.
    cls = getattr(pltpu, "CompilerParams", None) or getattr(pltpu, "TPUCompilerParams")
    return cls(**kw)


def _vmem_specs(n):
    return [pl.BlockSpec(memory_space=VMEM) for _ in range(n)]


def _vmem_limit_bytes():
    """Generation-aware scoped-VMEM budget (~56 MiB on v7x's 64 MiB, ~100 MiB on v5e/v6e)."""
    try:
        cap = int(pltpu.get_tpu_info().vmem_capacity_bytes)
    except Exception:
        cap = 64 * 1024 * 1024
    return int(min(cap - 8 * 1024 * 1024, 100 * 1024 * 1024))


def _pick_mlp_chunk(hidden):
    """Largest chunk <= 1024 columns that divides the MLP hidden dim."""
    if hidden <= 1024:
        return hidden
    for c in range(1024, 0, -128):
        if hidden % c == 0:
            return c
    return hidden


# --------------------------------------------------------------------------
# GCN kernel:  x -> A@(x@W1t)+b1 -> leaky_relu -> A@(h@W2t)+b2
# (weights pre-transposed on the host; propagate/linear reassociated by associativity;
#  adjacency in bf16 -- integer edge counts are exact in bf16, f32 accumulation on MXU)
# --------------------------------------------------------------------------
def gcn_kernel(a_ref, x_ref, w1t_ref, b1_ref, w2t_ref, b2_ref, o_ref):
    a = a_ref[...]                                                   # (N, N) bf16
    h = jnp.dot(x_ref[...], w1t_ref[...], preferred_element_type=jnp.float32)
    h = jnp.dot(a, h.astype(jnp.bfloat16), preferred_element_type=jnp.float32) + b1_ref[...]
    h = jnp.where(h >= 0, h, 0.01 * h)                               # F.leaky_relu (slope 0.01)
    h = jnp.dot(h, w2t_ref[...], preferred_element_type=jnp.float32)
    o_ref[...] = (jnp.dot(a, h.astype(jnp.bfloat16), preferred_element_type=jnp.float32)
                  + b2_ref[...])


def gnn_forward(adj, x, w1t, b1, w2t, b2):
    # TODO(synk): for large graphs, tile the dense (N, N) adjacency with a row grid instead
    # of loading it whole into VMEM (a 4096x4096 adjacency would not fit v7x's 64 MiB).
    n = x.shape[0]
    out_dim = w2t.shape[1]
    return pl.pallas_call(
        gcn_kernel,
        out_shape=jax.ShapeDtypeStruct((n, out_dim), jnp.float32),
        in_specs=_vmem_specs(6),
        out_specs=pl.BlockSpec(memory_space=VMEM),
    )(adj.astype(jnp.bfloat16), x, w1t, b1, w2t, b2)


# --------------------------------------------------------------------------
# Fused multi-layer transformer kernel.
# grid = (batch_tiles, num_layers): batch axis "parallel" (megacore), layer "arbitrary".
# The output block (constant index across the layer axis) is the resident activation buffer.
# --------------------------------------------------------------------------
def make_transformer_kernel(n_heads, mlp_chunk):
    def kernel(x_ref,
               ln1w_ref, ln1b_ref, wqkv_ref, bqkv_ref, wo_ref, bo_ref,
               ln2w_ref, ln2b_ref, wfc_ref, bfc_ref, wpr_ref, bpr_ref,
               o_ref, mask_ref):
        layer = pl.program_id(1)
        bsz, seq, d = x_ref.shape
        m = bsz * seq
        dh = d // n_heads
        hidden = wfc_ref.shape[1]
        n_chunks = hidden // mlp_chunk

        @pl.when(layer == 0)
        def _init():
            # load this batch tile's activations into the resident output block and build
            # the additive causal mask once (reused by every layer of this batch tile)
            o_ref[...] = x_ref[...]
            rows = jax.lax.broadcasted_iota(jnp.int32, (seq, seq), 0)
            cols = jax.lax.broadcasted_iota(jnp.int32, (seq, seq), 1)
            mask_ref[...] = jnp.where(cols > rows, -1e30, 0.0).astype(jnp.float32)

        def layer_norm(z, w, b):                                     # torch LayerNorm, eps=1e-5, f32
            mu = jnp.mean(z, axis=-1, keepdims=True)
            var = jnp.mean((z - mu) ** 2, axis=-1, keepdims=True)
            return (z - mu) * jax.lax.rsqrt(var + 1e-5) * w + b

        # NOTE: for real CLIP sizes pad L (77 -> 80/128) on the host so the (B,L)->M merge
        # below is relayout-free; at these test sizes L is already a multiple of 8.
        x2 = o_ref[...].reshape(m, d)                                # (M, D) f32, resident
        neg_mask = mask_ref[...]                                     # (L, L) f32

        # ---- attention branch ----
        y2 = layer_norm(x2, ln1w_ref[...], ln1b_ref[...]).astype(jnp.bfloat16)
        qkv = jnp.dot(y2, wqkv_ref[...], preferred_element_type=jnp.float32) + bqkv_ref[...]
        qkv = qkv.astype(jnp.bfloat16).reshape(bsz, seq, 3 * d)      # bf16 right after bias add
        wo = wo_ref[...]                                             # (D, D) bf16

        att = jnp.zeros((m, d), jnp.float32)
        for h in range(n_heads):                                     # merge-by-accumulation:
            off = h * dh                                             # no concat copies
            qh = qkv[:, :, off:off + dh]                             # (B, L, dh) bf16 (scale folded
            kh = qkv[:, :, d + off:d + off + dh]                     #  into Wq at init)
            vh = qkv[:, :, 2 * d + off:2 * d + off + dh]
            s = jnp.einsum('bld,bmd->blm', qh, kh,
                           preferred_element_type=jnp.float32)       # (B, L, L) f32
            s = s + neg_mask
            s = s - jnp.max(s, axis=-1, keepdims=True)
            p = jnp.exp(s)
            p = p / jnp.sum(p, axis=-1, keepdims=True)               # exact softmax
            ctx = jnp.einsum('blm,bmd->bld', p.astype(jnp.bfloat16), vh,
                             preferred_element_type=jnp.float32)     # (B, L, dh) f32
            att = att + jnp.dot(ctx.reshape(m, dh).astype(jnp.bfloat16),
                                wo[off:off + dh, :],
                                preferred_element_type=jnp.float32)  # += ctx_h @ Wo rows
        x2 = x2 + att + bo_ref[...]                                  # residual in f32

        # ---- MLP branch (hidden dim processed in chunks to cap the f32 temporary) ----
        z2 = layer_norm(x2, ln2w_ref[...], ln2b_ref[...]).astype(jnp.bfloat16)
        mlp = jnp.zeros((m, d), jnp.float32)
        for c in range(n_chunks):
            c0 = c * mlp_chunk
            hc = jnp.dot(z2, wfc_ref[:, c0:c0 + mlp_chunk],
                         preferred_element_type=jnp.float32) + bfc_ref[:, c0:c0 + mlp_chunk]
            hc = hc * jax.nn.sigmoid(1.702 * hc)                     # QuickGELU (f32)
            mlp = mlp + jnp.dot(hc.astype(jnp.bfloat16), wpr_ref[c0:c0 + mlp_chunk, :],
                                preferred_element_type=jnp.float32)
        x2 = x2 + mlp + bpr_ref[...]

        o_ref[...] = x2.reshape(bsz, seq, d)                         # stays resident across layers
    return kernel


def transformer_forward(x, tx, n_heads, batch_tile=None):
    B, L, D = x.shape
    n_layers = tx['wqkv'].shape[0]
    hidden = tx['wfc'].shape[2]

    # batch tile: keep at least 2 tiles when possible so v7x's second TensorCore gets work;
    # callers should shrink the tile further if VMEM (v7x: 64 MiB) demands it.
    if batch_tile is None:
        batch_tile = B
        for cand in range(B // 2, 0, -1):
            if B % cand == 0:
                batch_tile = cand
                break
    if B % batch_tile != 0:
        batch_tile = B
    grid = (B // batch_tile, n_layers)
    mlp_chunk = _pick_mlp_chunk(hidden)

    def w_spec(arr):
        tail = tuple(arr.shape[1:])
        zeros = (0,) * len(tail)
        return pl.BlockSpec((None,) + tail, lambda b, l: (l,) + zeros)

    order = ['ln1_w', 'ln1_b', 'wqkv', 'bqkv', 'wo', 'bo',
             'ln2_w', 'ln2_b', 'wfc', 'bfc', 'wpr', 'bpr']
    in_specs = ([pl.BlockSpec((batch_tile, L, D), lambda b, l: (b, 0, 0))]
                + [w_spec(tx[k]) for k in order])

    return pl.pallas_call(
        make_transformer_kernel(n_heads, mlp_chunk),
        out_shape=jax.ShapeDtypeStruct((B, L, D), jnp.float32),
        grid_spec=pltpu.PrefetchScalarGridSpec(
            num_scalar_prefetch=0,
            grid=grid,
            in_specs=in_specs,
            out_specs=pl.BlockSpec((batch_tile, L, D), lambda b, l: (b, 0, 0)),
            scratch_shapes=[pltpu.VMEM((L, L), jnp.float32)],        # causal mask
        ),
        compiler_params=_compiler_params(
            dimension_semantics=("parallel", "arbitrary"),
            vmem_limit_bytes=_vmem_limit_bytes(),
        ),
    )(x, *[tx[k] for k in order])


# --------------------------------------------------------------------------
# ln_final + text_projection fused kernel (applied to the gathered EOT-token rows)
# --------------------------------------------------------------------------
def ln_proj_kernel(x_ref, lnw_ref, lnb_ref, proj_ref, o_ref):
    x = x_ref[...]                                                   # (B, D) f32
    mu = jnp.mean(x, axis=-1, keepdims=True)
    var = jnp.mean((x - mu) ** 2, axis=-1, keepdims=True)
    y = (x - mu) * jax.lax.rsqrt(var + 1e-5) * lnw_ref[...] + lnb_ref[...]
    o_ref[...] = jnp.dot(y, proj_ref[...], preferred_element_type=jnp.float32)


def ln_proj_forward(x_sel, ln_w, ln_b, proj):
    return pl.pallas_call(
        ln_proj_kernel,
        out_shape=jax.ShapeDtypeStruct((x_sel.shape[0], proj.shape[1]), jnp.float32),
        in_specs=_vmem_specs(4),
        out_specs=pl.BlockSpec(memory_space=VMEM),
    )(x_sel, ln_w, ln_b, proj)


# --------------------------------------------------------------------------
# Parameter construction (deterministic, mirrors CLIP.initialize_parameters).
# Weight matrices are pre-transposed (contract on their leading dim) and stored in bf16;
# LayerNorm params / biases stay f32.  The 1/sqrt(dh) attention scale is folded into Wq.
# --------------------------------------------------------------------------
def init_params(key, args):
    D = args['transformer_width']
    L = args['context_length']
    layers = args['transformer_layers']
    heads = args['transformer_heads']
    dh = D // heads
    q_scale = 1.0 / math.sqrt(dh)
    proj_std = (D ** -0.5) * ((2 * layers) ** -0.5)
    attn_std = D ** -0.5
    fc_std = (2 * D) ** -0.5

    keys = iter(jax.random.split(key, 8 + 8 * layers))
    p = {}
    p['token_embedding'] = 0.02 * jax.random.normal(next(keys), (args['vocab_size'], D), jnp.float32)
    p['positional'] = 0.01 * jax.random.normal(next(keys), (L, D), jnp.float32)
    p['ln_final_w'] = jnp.ones((1, D), jnp.float32)
    p['ln_final_b'] = jnp.zeros((1, D), jnp.float32)
    p['text_projection'] = (D ** -0.5) * jax.random.normal(next(keys), (D, args['embed_dim']), jnp.float32)

    ln1w, ln1b, wqkv, bqkv, wo, bo = [], [], [], [], [], []
    ln2w, ln2b, wfc, bfc, wpr, bpr = [], [], [], [], [], []
    for _ in range(layers):
        in_proj_w = attn_std * jax.random.normal(next(keys), (3 * D, D), jnp.float32)   # [Wq;Wk;Wv]
        in_proj_w = in_proj_w.at[:D, :].multiply(q_scale)            # fold 1/sqrt(dh) into Wq
        wqkv.append(in_proj_w.T.astype(jnp.bfloat16))                # (D, 3D)
        bqkv.append(jnp.zeros((1, 3 * D), jnp.float32))              # in_proj bias = 0 (scale-safe)
        wo.append((proj_std * jax.random.normal(next(keys), (D, D), jnp.float32)).T.astype(jnp.bfloat16))
        bo.append(jnp.zeros((1, D), jnp.float32))
        ln1w.append(jnp.ones((1, D), jnp.float32)); ln1b.append(jnp.zeros((1, D), jnp.float32))
        ln2w.append(jnp.ones((1, D), jnp.float32)); ln2b.append(jnp.zeros((1, D), jnp.float32))
        wfc.append((fc_std * jax.random.normal(next(keys), (4 * D, D), jnp.float32)).T.astype(jnp.bfloat16))
        bfc.append(jnp.zeros((1, 4 * D), jnp.float32))
        wpr.append((proj_std * jax.random.normal(next(keys), (D, 4 * D), jnp.float32)).T.astype(jnp.bfloat16))
        bpr.append(jnp.zeros((1, D), jnp.float32))

    stack = lambda lst: jnp.stack(lst, axis=0)                       # leading layer axis
    p['tx'] = dict(ln1_w=stack(ln1w), ln1_b=stack(ln1b),
                   wqkv=stack(wqkv), bqkv=stack(bqkv),
                   wo=stack(wo), bo=stack(bo),
                   ln2_w=stack(ln2w), ln2_b=stack(ln2b),
                   wfc=stack(wfc), bfc=stack(bfc),
                   wpr=stack(wpr), bpr=stack(bpr))

    # GNN (xavier_uniform weights, zero biases) — pre-transposed for the kernel
    def xavier(k, shape):
        bound = math.sqrt(6.0 / (shape[0] + shape[1]))
        return jax.random.uniform(k, shape, jnp.float32, -bound, bound)
    p['gnn_w1t'] = xavier(next(keys), (args['gnn_hid'], args['gnn_input'])).T
    p['gnn_b1'] = jnp.zeros((1, args['gnn_hid']), jnp.float32)
    p['gnn_w2t'] = xavier(next(keys), (args['gnn_output'], args['gnn_hid'])).T
    p['gnn_b2'] = jnp.zeros((1, args['gnn_output']), jnp.float32)
    return p


# --------------------------------------------------------------------------
# CLIP forward
# --------------------------------------------------------------------------
def encode_text(text, params, args, batch_tile=None):
    tok = params['token_embedding'][text]                            # embedding gather (XLA glue)
    x = tok + params['positional'][None, :, :]                       # (B, L, D)
    x = transformer_forward(x, params['tx'], args['transformer_heads'], batch_tile=batch_tile)
    eot = jnp.argmax(text, axis=-1)                                  # x[arange(B), text.argmax(-1)]
    x_sel = x[jnp.arange(text.shape[0]), eot]                        # (B, D); LN is per-position so
    return ln_proj_forward(x_sel, params['ln_final_w'],              # gather-then-LN == LN-then-gather
                           params['ln_final_b'], params['text_projection'])


def clip_forward(params, args, g_adj, g_x, s_n, t_n, s_n_text, t_n_text, batch_tile=None):
    # t_n is accepted but unused, as in the reference forward()
    embs = gnn_forward(g_adj, g_x, params['gnn_w1t'], params['gnn_b1'],
                       params['gnn_w2t'], params['gnn_b2'])
    s_image_features = embs[s_n]                                     # encode_graph: embs[idx_train]

    # batch the two encode_text calls: transformer weights are streamed through HBM once
    n_s = s_n_text.shape[0]
    text_all = jnp.concatenate([s_n_text, t_n_text], axis=0)
    feats = encode_text(text_all, params, args, batch_tile=batch_tile)
    s_text_features = feats[:n_s]
    t_text_features = feats[n_s:].reshape(n_s, args['neigh_num'], args['embed_dim'])
    t_text_features = jnp.mean(t_text_features, axis=1)

    # Tiny (B, 16) epilogue: plain XLA beats extra kernel launches here.
    def l2norm(v):                                                   # matches x / (x.norm() + 1e-8)
        return v / (jnp.sqrt(jnp.sum(v * v, axis=-1, keepdims=True)) + 1e-8)
    s_image_features = l2norm(s_image_features)
    s_text_features = l2norm(s_text_features)
    t_text_features = l2norm(t_text_features)
    labels = jnp.arange(s_image_features.shape[0], dtype=jnp.int32)
    return s_image_features, s_text_features, t_text_features, labels


# --------------------------------------------------------------------------
def build_dense_adj(edge_index, num_nodes):
    # MessagePassing(aggr='add'), default message(x_j):  out[target] += x[source]
    # add_remaining_self_loops: add a self loop (weight 1) only for nodes missing one.
    src, dst = edge_index
    A = np.zeros((num_nodes, num_nodes), np.float32)
    for s, d in zip(src, dst):
        A[d, s] += 1.0
    for i in range(num_nodes):
        if A[i, i] == 0.0:
            A[i, i] = 1.0
    return jnp.asarray(A)


if __name__ == "__main__":
    # NOTE: toy feature dims (D=32, dh=8, embed_dim=16) underfill the 128-lane vreg;
    # real deployment (D=512, L=77->pad 80) is lane-dense and is what the kernel targets.
    args = dict(
        context_length=8, transformer_width=32, transformer_layers=2, transformer_heads=4,
        vocab_size=64, embed_dim=16,
        gnn_type='gcn', gnn_input=32, gnn_hid=32, gnn_output=16,
        neigh_num=2, edge_coef=1.0, lr=1e-3,
    )
    key = jax.random.PRNGKey(0)
    k_par, k_x, k_s, k_t = jax.random.split(key, 4)

    params = init_params(k_par, args)

    # small synthetic graph: 8 nodes, ring edges (both directions) + two chords
    num_nodes = 8
    src = np.array([0, 1, 2, 3, 4, 5, 6, 7, 1, 2, 3, 4, 5, 6, 7, 0, 0, 5], np.int32)
    dst = np.array([1, 2, 3, 4, 5, 6, 7, 0, 0, 1, 2, 3, 4, 5, 6, 7, 4, 1], np.int32)
    g_adj = build_dense_adj((src, dst), num_nodes)                          # (8, 8)
    g_x = jax.random.normal(k_x, (num_nodes, args['gnn_input']), jnp.float32)  # (8, 32)

    s_n = jnp.array([1, 4], dtype=jnp.int32)                                # train node ids
    t_n = jnp.array([2, 5], dtype=jnp.int32)                                # unused by forward
    n_train = s_n.shape[0]
    s_n_text = jax.random.randint(k_s, (n_train, args['context_length']), 0, args['vocab_size'], jnp.int32)
    t_n_text = jax.random.randint(k_t, (n_train * args['neigh_num'], args['context_length']),
                                  0, args['vocab_size'], jnp.int32)

    # combined text batch = 2 + 4 = 6; batch_tile=3 exercises the (batch_tiles, layers) grid
    out = clip_forward(params, args, g_adj, g_x, s_n, t_n, s_n_text, t_n_text, batch_tile=3)
    out = jax.block_until_ready(out)
    s_img, s_txt, t_txt, labels = out
    assert s_img.shape == (n_train, args['gnn_output'])
    assert s_txt.shape == (n_train, args['embed_dim'])
    assert t_txt.shape == (n_train, args['embed_dim'])
    assert labels.shape == (n_train,)
    assert all(bool(jnp.all(jnp.isfinite(a))) for a in (s_img, s_txt, t_txt))
    print("KERNEL_OK")
</pallas_src>

<mosaic_0001>
module attributes {stable_mosaic.version = 11 : i64} {
  func.func @gcn_kernel(%arg0: memref<8x8xbf16, #tpu.memory_space<vmem>>, %arg1: memref<8x32xf32, #tpu.memory_space<vmem>>, %arg2: memref<32x32xf32, #tpu.memory_space<vmem>>, %arg3: memref<1x32xf32, #tpu.memory_space<vmem>>, %arg4: memref<32x16xf32, #tpu.memory_space<vmem>>, %arg5: memref<1x16xf32, #tpu.memory_space<vmem>>, %arg6: memref<8x16xf32, #tpu.memory_space<vmem>>) attributes {dimension_semantics = [], scalar_prefetch = 0 : i64, scratch_operands = 0 : i64, tpu.core_type = #tpu.core_type<tc>} {
    %c0 = arith.constant 0 : index
    %c0_0 = arith.constant 0 : index
    %0 = vector.load %arg0[%c0, %c0_0] : memref<8x8xbf16, #tpu.memory_space<vmem>>, vector<8x8xbf16>
    %c0_1 = arith.constant 0 : index
    %c0_2 = arith.constant 0 : index
    %1 = vector.load %arg1[%c0_1, %c0_2] : memref<8x32xf32, #tpu.memory_space<vmem>>, vector<8x32xf32>
    %c0_3 = arith.constant 0 : index
    %c0_4 = arith.constant 0 : index
    %2 = vector.load %arg2[%c0_3, %c0_4] : memref<32x32xf32, #tpu.memory_space<vmem>>, vector<32x32xf32>
    %cst = arith.constant dense<0.000000e+00> : vector<8x32xf32>
    %3 = tpu.matmul %1, %2, %cst {dimension_numbers = #tpu.dot_dimension_numbers<[1], [0], [0], [1], [0, 0, 1, 1], [], []>} : vector<8x32xf32>, vector<32x32xf32>, vector<8x32xf32> -> vector<8x32xf32>
    %4 = arith.truncf %3 : vector<8x32xf32> to vector<8x32xbf16>
    %cst_5 = arith.constant dense<0.000000e+00> : vector<8x32xf32>
    %5 = tpu.matmul %0, %4, %cst_5 {dimension_numbers = #tpu.dot_dimension_numbers<[1], [0], [0], [1], [0, 0, 1, 1], [], []>} : vector<8x8xbf16>, vector<8x32xbf16>, vector<8x32xf32> -> vector<8x32xf32>
    %c0_6 = arith.constant 0 : index
    %c0_7 = arith.constant 0 : index
    %6 = vector.load %arg3[%c0_6, %c0_7] : memref<1x32xf32, #tpu.memory_space<vmem>>, vector<1x32xf32>
    %7 = vector.broadcast %6 : vector<1x32xf32> to vector<8x32xf32>
    %8 = arith.addf %5, %7 : vector<8x32xf32>
    %cst_8 = arith.constant 0.000000e+00 : f32
    %9 = vector.broadcast %cst_8 : f32 to vector<8x32xf32>
    %10 = arith.cmpf oge, %8, %9 : vector<8x32xf32>
    %cst_9 = arith.constant 0.00999999977 : f32
    %11 = vector.broadcast %cst_9 : f32 to vector<8x32xf32>
    %12 = arith.mulf %11, %8 : vector<8x32xf32>
    %13 = arith.select %10, %8, %12 : vector<8x32xi1>, vector<8x32xf32>
    %c0_10 = arith.constant 0 : index
    %c0_11 = arith.constant 0 : index
    %14 = vector.load %arg4[%c0_10, %c0_11] : memref<32x16xf32, #tpu.memory_space<vmem>>, vector<32x16xf32>
    %cst_12 = arith.constant dense<0.000000e+00> : vector<8x16xf32>
    %15 = tpu.matmul %13, %14, %cst_12 {dimension_numbers = #tpu.dot_dimension_numbers<[1], [0], [0], [1], [0, 0, 1, 1], [], []>} : vector<8x32xf32>, vector<32x16xf32>, vector<8x16xf32> -> vector<8x16xf32>
    %16 = arith.truncf %15 : vector<8x16xf32> to vector<8x16xbf16>
    %cst_13 = arith.constant dense<0.000000e+00> : vector<8x16xf32>
    %17 = tpu.matmul %0, %16, %cst_13 {dimension_numbers = #tpu.dot_dimension_numbers<[1], [0], [0], [1], [0, 0, 1, 1], [], []>} : vector<8x8xbf16>, vector<8x16xbf16>, vector<8x16xf32> -> vector<8x16xf32>
    %c0_14 = arith.constant 0 : index
    %c0_15 = arith.constant 0 : index
    %18 = vector.load %arg5[%c0_14, %c0_15] : memref<1x16xf32, #tpu.memory_space<vmem>>, vector<1x16xf32>
    %19 = vector.broadcast %18 : vector<1x16xf32> to vector<8x16xf32>
    %20 = arith.addf %17, %19 : vector<8x16xf32>
    %c0_16 = arith.constant 0 : index
    %c0_17 = arith.constant 0 : index
    %21 = vector.load %arg6[%c0_16, %c0_17] : memref<8x16xf32, #tpu.memory_space<vmem>>, vector<8x16xf32>
    tpu.vector_store %arg6[%c0_16, %c0_17], %20 {strides = array<i32>} : memref<8x16xf32, #tpu.memory_space<vmem>>, vector<8x16xf32>,
    return
  }
}

</mosaic_0001>

<bundles_post_ra>
// kernel: tpu_custom_call.1
= control target key start
LH: loop header
LB: loop body
LE: loop exit
PB: predicated region body
PF: predicated region fallthrough
CT: control target
= control target key end

     0   :  { %s264_s0 = inlined_call_operand.vmem [shape: bf16[8,8], index: 0, kind: input, shape index: {}]   ;;  %s265_s1 = inlined_call_operand.vmem [shape: f32[8,32], index: 1, kind: input, shape index: {}]   ;;  %s266_s2 = inlined_call_operand.vmem [shape: f32[32,32], index: 2, kind: input, shape index: {}]   ;;  %s267_s3 = inlined_call_operand.vmem [shape: f32[1,32], index: 3, kind: input, shape index: {}]   ;;  %s268_s4 = inlined_call_operand.vmem [shape: f32[32,16], index: 4, kind: input, shape index: {}]   ;;  %s269_s5 = inlined_call_operand.vmem [shape: f32[1,16], index: 5, kind: input, shape index: {}]   ;;  %s270_s6 = inlined_call_operand.hbm [shape: f32[8,16], index: 6, kind: output, shape index: {}]  }
   0x1   :  { %v30_v0 = vld [vmem:[%s266_s2 + $0x18] sm:$0xff]  ;;  %v29_v1 = vld [vmem:[%s266_s2 + $0x10] sm:$0xff]  ;;  %v28_v2 = vld [vmem:[%s266_s2 + $0x8] sm:$0xff] }
   0x2   :  { %47 = vmatpush.msra.mxu0 %v30_v0 }
   0x3   :  { %11 = vsyncpa [#allocation3], 0  ;;  %v27_v3 = vld [vmem:[%s266_s2] sm:$0xff]  ;;  %vm31_vm0 = vcmask 261120   ;;  %v87_v5 = vld [vmem:[%s268_s4 + $0x18] sm:$0xff]  ;;  %vm64_vm1 = vcmask 1043456  }
   0x4   :  { %48 = vmatpush.msra.mxu0 %v29_v1  ;;  %v26_v4 = vld [vmem:[%s265_s1] sm:$0xff]  ;;  %103 = vmatpush.msra.mxu2 %v87_v5  ;;  %vm60_vm2 = vcmask 64512   ;;  %v86_v10 = vld [vmem:[%s268_s4 + $0x10] sm:$0xff]  ;;  %v85_v11 = vld [vmem:[%s268_s4 + $0x8] sm:$0xff]  ;;  %s141_s20 = sshll.u32 %s270_s6, 4  ;;  %vm132_vm4 = vcmask 130048   ;;  %s142_s20 = int_to_ptr.hbm [resolvable:$true] %s141_s20 }
   0x5   :  { %v25_v9 = vld [vmem:[%s264_s0] sm:$0xf] }
   0x6   :  { %49 = vmatpush.msra.mxu0 %v28_v2  ;;  %104 = vmatpush.msra.mxu2 %v86_v10  ;;  %v84_v12 = vld [vmem:[%s268_s4] sm:$0xff] }
   0x7   :  { %v155_v13 = vld [vmem:[%s267_s3] ss:$0 sm:$0xff]  ;;  %s183_s3 = smov [#allocation2]  }
   0x8   :  { %50 = vmatpush.msra.mxu0 %v27_v3  ;;  %105 = vmatpush.msra.mxu2 %v85_v11  ;;  %v156_v22 = vld [vmem:[%s269_s5] ss:$0 sm:$0xff]  ;;  %s139_s17 = sshll.u32 %s183_s3, 4  ;;  %s140_s17 = int_to_ptr.vmem [resolvable:$true] %s139_s17 }
   0x9   :  { %150 = vmatmul.msk.f32.vlgmr.msra.gmra.mxu0 %vm31_vm0, %v26_v4 }
   0xa   :  { %106 = vmatpush.msra.mxu2 %v84_v12 }
  0x86   :  { %v52_v6 = vpop.f32.mrf.mxu0 }
  0x87   :  { %v55_v7 = vpack.c.bf16 %v52_v6, %v52_v6 }
  0x89   :  { %v66_v8 = vsel %vm64_vm1, %v55_v7, 0 }
  0x8a   :  { %75 = vmatpush.bf16.msra.mxu1 %v66_v8 }
  0x8d   :  { %151 = vmatmul.msk.bf16.vlgmr.msra.gmra.mxu1 %vm60_vm2, %v25_v9 }
 0x10a   :  { %v77_v14 = vpop.f32.mrf.mxu1 }
 0x10b   :  { %v78_v15 = vadd.f32 %v155_v13, %v77_v14 }
 0x10d   :  { %v82_v16 = vmul.f32 0.01, %v78_v15  ;;  %vm81_vm3 = vcmp.ge.f32.partialorder %v78_v15, 0.0 }
 0x10f   :  { %v83_v17 = vsel %vm81_vm3, %v78_v15, %v82_v16 }
 0x110   :  { %152 = vmatmul.msk.f32.vlgmr.msra.gmra.mxu2 %vm31_vm0, %v83_v17 }
 0x112   :  { %v79_v18 = vpop.f32.mrf.mxu1 }
 0x193   :  { %v108_v19 = vpop.f32.mrf.mxu2 }
 0x194   :  { %v111_v20 = vpack.c.bf16 %v108_v19, %v108_v19 }
 0x196   :  { %v117_v21 = vsel %vm64_vm1, %v111_v20, 0 }
 0x197   :  { %126 = vmatpush.bf16.msra.mxu3 %v117_v21 }
 0x19a   :  { %153 = vmatmul.msk.bf16.vlgmr.msra.gmra.mxu3 %vm60_vm2, %v25_v9 }
 0x21d   :  { %v128_v23 = vpop.f32.mrf.mxu3 }
 0x21e   :  { %v129_v24 = vadd.f32 %v156_v22, %v128_v23 }
 0x220   :  { %133 = vst.msk [vmem:[#allocation2] sm:$0xff] %vm132_vm4, %v129_v24 }
 0x221   :  { %144 = dma.vmem_to_hbm [thread:$0]  %s140_s17, 128, %s142_s20, [#allocation3]  }
 0x225   :  { %v130_v25 = vpop.f32.mrf.mxu3 }
 0x226   :  { %181 = dma.done.wait [#allocation3], 128  }
 0x227   :  { %182 = vsyncadd [#allocation3], 4294967168 }
 0x228   :  { %149 = vsyncpa [#allocation3], 1 }

</bundles_post_ra>
